<compile_context>
chip_gen: v5e
topology: v5e:2x2
jax: 0.10.0
libtpu: 0.0.40
codegen_flags: <defaults>
</compile_context>

<pallas_src>
import functools

import jax
import jax.numpy as jnp
from jax.experimental import pallas as pl
from jax.experimental.pallas import tpu as pltpu


_VMEM_LIMIT = 48 * 1024 * 1024  # safe on v5e/v6e (128 MiB) and v7x (64 MiB) alike


def _round_up(x, m):
    return (x + m - 1) // m * m


def _cparams():
    return pltpu.CompilerParams(
        dimension_semantics=("parallel", "parallel"),
        vmem_limit_bytes=_VMEM_LIMIT)


# ------------------------------------------------- fused value / (offset|attn) projections
def _proj_kernel(src_ref, pos_ref, wv_ref, bv_ref, wq_ref, bq_ref, val_ref, qp_ref):
    s = src_ref[...].astype(jnp.float32)
    q = (s + pos_ref[...].astype(jnp.float32)).astype(jnp.bfloat16)   # with_pos_embed
    sb = s.astype(jnp.bfloat16)
    val = jnp.dot(sb, wv_ref[...], preferred_element_type=jnp.float32) + bv_ref[...]
    qp = jnp.dot(q, wq_ref[...], preferred_element_type=jnp.float32) + bq_ref[...]
    val_ref[...] = val.astype(val_ref.dtype)
    qp_ref[...] = qp.astype(qp_ref.dtype)


# ------------------------------------------------- multi-scale deformable attention core
def _msda_kernel(qp_ref, ref_ref, *rest, spatial_shapes, n_heads, n_points, head_dim):
    value_refs = rest[:-1]          # one (M, H_l, W_l*D) ref per level (bf16)
    o_ref = rest[-1]
    L = len(spatial_shapes)
    P = n_points
    D = head_dim
    M = n_heads
    T = qp_ref.shape[0]

    qp = qp_ref[...].astype(jnp.float32)        # (T, M*3*L*P): per head [x | y | logits]
    refp = ref_ref[...].astype(jnp.float32)     # (T, 2*L):     per level [ref_x, ref_y]

    # per-head softmax over the L*P attention logits
    attn = []
    for h in range(M):
        base = h * 3 * L * P
        logits = qp[:, base + 2 * L * P: base + 3 * L * P]
        mx = jnp.max(logits, axis=-1, keepdims=True)
        e = jnp.exp(logits - mx)
        attn.append(e * pl.reciprocal(jnp.sum(e, axis=-1, keepdims=True), approx=True))

    accs = [jnp.zeros((T, D), jnp.float32) for _ in range(M)]

    for l, (H, W) in enumerate(spatial_shapes):
        WD = W * D
        # per-lane column coordinate and the (W*D, D) fold-back (sum over x) matrix
        iota_y = jax.lax.broadcasted_iota(jnp.float32, (T, H), 1)
        iota_x = (jax.lax.broadcasted_iota(jnp.int32, (T, WD), 1) // D).astype(jnp.float32)
        sel = (jax.lax.broadcasted_iota(jnp.int32, (WD, D), 0) % D
               == jax.lax.broadcasted_iota(jnp.int32, (WD, D), 1)).astype(jnp.float32)
        for h in range(M):
            v_hl = value_refs[l][h]                                        # (H, W*D) bf16
            base = h * 3 * L * P
            offx = qp[:, base + l * P: base + (l + 1) * P]                 # (T, P)
            offy = qp[:, base + L * P + l * P: base + L * P + (l + 1) * P]
            a_h = attn[h][:, l * P: (l + 1) * P]                           # (T, P)
            # grid_sample(align_corners=False): pixel = loc*size - 0.5 with
            # loc = ref + off / (W, H)  =>  pixel = ref*size + off - 0.5
            px = refp[:, 2 * l: 2 * l + 1] * W + offx - 0.5
            py = refp[:, 2 * l + 1: 2 * l + 2] * H + offy - 0.5
            for p in range(P):
                # bilinear "tent" weights; out-of-range rows/cols get weight 0 (zeros padding)
                ky = jnp.maximum(0.0, 1.0 - jnp.abs(iota_y - py[:, p:p + 1]))    # (T, H)
                kx = a_h[:, p:p + 1] * jnp.maximum(
                    0.0, 1.0 - jnp.abs(iota_x - px[:, p:p + 1]))                  # (T, W*D)
                g = jnp.dot(ky.astype(jnp.bfloat16), v_hl,
                            preferred_element_type=jnp.float32)                   # (T, W*D)
                accs[h] = accs[h] + jnp.dot(kx * g, sel,
                                            preferred_element_type=jnp.float32)   # (T, D)

    o_ref[...] = jnp.concatenate(accs, axis=-1).astype(o_ref.dtype)


# ------------------------------------------------- output proj + residual + LayerNorm1
def _outproj_ln_kernel(attn_ref, res_ref, w_ref, b_ref, g_ref, beta_ref, o_ref, *, eps):
    y = jnp.dot(attn_ref[...].astype(jnp.bfloat16), w_ref[...],
                preferred_element_type=jnp.float32) + b_ref[...]
    x = res_ref[...].astype(jnp.float32) + y
    mean = jnp.mean(x, axis=-1, keepdims=True)
    cent = x - mean
    var = jnp.mean(cent * cent, axis=-1, keepdims=True)
    out = cent * jax.lax.rsqrt(var + eps)
    o_ref[...] = (out * g_ref[...] + beta_ref[...]).astype(o_ref.dtype)


# ------------------------------------------------- FFN (lin1+relu+lin2) + residual + LayerNorm2
def _ffn_ln_kernel(x_ref, w1_ref, b1_ref, w2_ref, b2_ref, g_ref, beta_ref, o_ref, *, eps):
    x = x_ref[...].astype(jnp.float32)
    h = jnp.dot(x.astype(jnp.bfloat16), w1_ref[...],
                preferred_element_type=jnp.float32) + b1_ref[...]
    h = jnp.maximum(h, 0.0)
    y = jnp.dot(h.astype(jnp.bfloat16), w2_ref[...],
                preferred_element_type=jnp.float32) + b2_ref[...]
    z = x + y
    mean = jnp.mean(z, axis=-1, keepdims=True)
    cent = z - mean
    var = jnp.mean(cent * cent, axis=-1, keepdims=True)
    out = cent * jax.lax.rsqrt(var + eps)
    o_ref[...] = (out * g_ref[...] + beta_ref[...]).astype(o_ref.dtype)


# ------------------------------------------------------------------ full encoder layer
def deformable_encoder_layer(params, src, pos, reference_points, spatial_shapes,
                             n_heads, n_points, padding_mask=None,
                             seq_tile=256, eps=1e-5):
    N, Lq, C = src.shape
    L = len(spatial_shapes)
    M, P = n_heads, n_points
    D = C // M
    Len_in = sum(h * w for h, w in spatial_shapes)
    assert Lq == Len_in, "encoder layer: queries are the flattened pixels"

    # ---- pad the sequence to a tile multiple (padded rows are zeros, sliced off at the end)
    tile = _round_up(min(int(seq_tile), _round_up(Lq, 8)), 8)
    Lq_pad = _round_up(Lq, tile)
    n_qt = Lq_pad // tile
    pad = Lq_pad - Lq
    if pad:
        src_p = jnp.pad(src, ((0, 0), (0, pad), (0, 0)))
        pos_p = jnp.pad(pos, ((0, 0), (0, pad), (0, 0)))
        ref_p = jnp.pad(reference_points, ((0, 0), (0, pad), (0, 0), (0, 0)))
        mask_p = (jnp.pad(padding_mask, ((0, 0), (0, pad)), constant_values=True)
                  if padding_mask is not None else None)
    else:
        src_p, pos_p, ref_p, mask_p = src, pos, reference_points, padding_mask
    ref_flat = ref_p.reshape(N, Lq_pad, 2 * L)

    # ---- fused, column-permuted query projection weights:
    #      output layout per head h: [x offsets (L*P) | y offsets (L*P) | attn logits (L*P)]
    n_off = M * L * P * 2
    w_cat = jnp.concatenate([params['W_off'], params['W_attn']], axis=1)
    b_cat = jnp.concatenate([params['b_off'], params['b_attn']], axis=0)
    perm = []
    for h in range(M):
        for l in range(L):
            for p in range(P):
                perm.append(((h * L + l) * P + p) * 2 + 0)        # x offsets
        for l in range(L):
            for p in range(P):
                perm.append(((h * L + l) * P + p) * 2 + 1)        # y offsets
        for l in range(L):
            for p in range(P):
                perm.append(n_off + (h * L + l) * P + p)          # attn logits
    perm = jnp.asarray(perm, jnp.int32)
    w_qo = w_cat[:, perm].astype(jnp.bfloat16)
    b_qo = b_cat[perm].reshape(1, -1).astype(jnp.float32)
    F = M * 3 * L * P

    w_val = params['W_val'].astype(jnp.bfloat16)
    b_val = params['b_val'].reshape(1, C).astype(jnp.float32)

    # ---- kernel 1: value projection + fused (offset|attn) projection (one pass over src/pos)
    value, qproj = pl.pallas_call(
        _proj_kernel,
        out_shape=(jax.ShapeDtypeStruct((N, Lq_pad, C), jnp.bfloat16),
                   jax.ShapeDtypeStruct((N, Lq_pad, F), jnp.float32)),
        grid=(N, n_qt),
        in_specs=[
            pl.BlockSpec((None, tile, C), lambda n, t: (n, t, 0)),
            pl.BlockSpec((None, tile, C), lambda n, t: (n, t, 0)),
            pl.BlockSpec((C, C), lambda n, t: (0, 0)),
            pl.BlockSpec((1, C), lambda n, t: (0, 0)),
            pl.BlockSpec((C, F), lambda n, t: (0, 0)),
            pl.BlockSpec((1, F), lambda n, t: (0, 0)),
        ],
        out_specs=(pl.BlockSpec((None, tile, C), lambda n, t: (n, t, 0)),
                   pl.BlockSpec((None, tile, F), lambda n, t: (n, t, 0))),
        compiler_params=_cparams(),
    )(src_p, pos_p, w_val, b_val, w_qo, b_qo)

    if mask_p is not None:
        value = jnp.where(mask_p[..., None], 0.0, value).astype(jnp.bfloat16)

    # ---- per-level, head-major value layout (cheap one-time XLA rearrangement):
    #      value_l[n, h, y, x*D + d] == value[n, level_start + y*W + x, h*D + d]
    value_levels = []
    start = 0
    for (H, W) in spatial_shapes:
        v = value[:, start:start + H * W, :]
        v = v.reshape(N, H, W, M, D).transpose(0, 3, 1, 2, 4).reshape(N, M, H, W * D)
        value_levels.append(v)
        start += H * W

    # ---- kernel 2: multi-scale deformable attention (all heads, lane-dense (tile, C) output)
    msda = functools.partial(_msda_kernel, spatial_shapes=tuple(spatial_shapes),
                             n_heads=M, n_points=P, head_dim=D)
    attn_out = pl.pallas_call(
        msda,
        out_shape=jax.ShapeDtypeStruct((N, Lq_pad, C), jnp.float32),
        grid=(N, n_qt),
        in_specs=[
            pl.BlockSpec((None, tile, F), lambda n, t: (n, t, 0)),
            pl.BlockSpec((None, tile, 2 * L), lambda n, t: (n, t, 0)),
        ] + [
            pl.BlockSpec((None, M, H, W * D), lambda n, t: (n, 0, 0, 0))
            for (H, W) in spatial_shapes
        ],
        out_specs=pl.BlockSpec((None, tile, C), lambda n, t: (n, t, 0)),
        compiler_params=_cparams(),
    )(qproj, ref_flat, *value_levels)

    # ---- kernel 3: output projection + residual + LayerNorm1 (dropout == identity)
    src1 = pl.pallas_call(
        functools.partial(_outproj_ln_kernel, eps=eps),
        out_shape=jax.ShapeDtypeStruct((N, Lq_pad, C), jnp.float32),
        grid=(N, n_qt),
        in_specs=[
            pl.BlockSpec((None, tile, C), lambda n, t: (n, t, 0)),
            pl.BlockSpec((None, tile, C), lambda n, t: (n, t, 0)),
            pl.BlockSpec((C, C), lambda n, t: (0, 0)),
            pl.BlockSpec((1, C), lambda n, t: (0, 0)),
            pl.BlockSpec((1, C), lambda n, t: (0, 0)),
            pl.BlockSpec((1, C), lambda n, t: (0, 0)),
        ],
        out_specs=pl.BlockSpec((None, tile, C), lambda n, t: (n, t, 0)),
        compiler_params=_cparams(),
    )(attn_out, src_p,
      params['W_out'].astype(jnp.bfloat16),
      params['b_out'].reshape(1, C).astype(jnp.float32),
      params['ln1_g'].reshape(1, C).astype(jnp.float32),
      params['ln1_b'].reshape(1, C).astype(jnp.float32))

    # ---- kernel 4: FFN (linear1 + relu + linear2) + residual + LayerNorm2
    d_ffn = params['W_ffn1'].shape[1]
    out = pl.pallas_call(
        functools.partial(_ffn_ln_kernel, eps=eps),
        out_shape=jax.ShapeDtypeStruct((N, Lq_pad, C), jnp.float32),
        grid=(N, n_qt),
        in_specs=[
            pl.BlockSpec((None, tile, C), lambda n, t: (n, t, 0)),
            pl.BlockSpec((C, d_ffn), lambda n, t: (0, 0)),
            pl.BlockSpec((1, d_ffn), lambda n, t: (0, 0)),
            pl.BlockSpec((d_ffn, C), lambda n, t: (0, 0)),
            pl.BlockSpec((1, C), lambda n, t: (0, 0)),
            pl.BlockSpec((1, C), lambda n, t: (0, 0)),
            pl.BlockSpec((1, C), lambda n, t: (0, 0)),
        ],
        out_specs=pl.BlockSpec((None, tile, C), lambda n, t: (n, t, 0)),
        compiler_params=_cparams(),
    )(src1,
      params['W_ffn1'].astype(jnp.bfloat16),
      params['b_ffn1'].reshape(1, d_ffn).astype(jnp.float32),
      params['W_ffn2'].astype(jnp.bfloat16),
      params['b_ffn2'].reshape(1, C).astype(jnp.float32),
      params['ln2_g'].reshape(1, C).astype(jnp.float32),
      params['ln2_b'].reshape(1, C).astype(jnp.float32))

    return out[:, :Lq, :]


# ------------------------------------------------------------------ deterministic parameter init
def init_params(key, d_model, d_ffn, n_levels, n_heads, n_points):
    def lin(k, din, dout):
        k1, k2 = jax.random.split(k)
        bound = 1.0 / (din ** 0.5)
        w = jax.random.uniform(k1, (din, dout), jnp.float32, -bound, bound)
        b = jax.random.uniform(k2, (dout,), jnp.float32, -bound, bound)
        return w, b

    ks = jax.random.split(key, 6)
    p = {}
    p['W_off'], p['b_off'] = lin(ks[0], d_model, n_heads * n_levels * n_points * 2)
    p['W_attn'], p['b_attn'] = lin(ks[1], d_model, n_heads * n_levels * n_points)
    p['W_val'], p['b_val'] = lin(ks[2], d_model, d_model)
    p['W_out'], p['b_out'] = lin(ks[3], d_model, d_model)
    p['W_ffn1'], p['b_ffn1'] = lin(ks[4], d_model, d_ffn)
    p['W_ffn2'], p['b_ffn2'] = lin(ks[5], d_ffn, d_model)
    p['ln1_g'] = jnp.ones((d_model,), jnp.float32)
    p['ln1_b'] = jnp.zeros((d_model,), jnp.float32)
    p['ln2_g'] = jnp.ones((d_model,), jnp.float32)
    p['ln2_b'] = jnp.zeros((d_model,), jnp.float32)
    return p


if __name__ == "__main__":
    d_model, d_ffn, n_levels, n_heads, n_points = 32, 64, 2, 4, 4
    spatial_shapes = [(8, 8), (4, 4)]                 # (H, W) per level
    N = 2
    Len_in = sum(h * w for h, w in spatial_shapes)    # 80
    Lq = Len_in                                       # encoder: queries == flattened pixels

    key = jax.random.PRNGKey(0)
    kp, ks, kpos, kref = jax.random.split(key, 4)
    params = init_params(kp, d_model, d_ffn, n_levels, n_heads, n_points)

    src = jax.random.normal(ks, (N, Lq, d_model), jnp.float32)
    pos = jax.random.normal(kpos, (N, Lq, d_model), jnp.float32)
    reference_points = jax.random.uniform(kref, (N, Lq, n_levels, 2), jnp.float32)

    out = deformable_encoder_layer(params, src, pos, reference_points,
                                   spatial_shapes, n_heads, n_points,
                                   padding_mask=None)
    out = jax.block_until_ready(out)
    assert out.shape == (N, Lq, d_model)
    assert bool(jnp.all(jnp.isfinite(out)))
    print("KERNEL_OK")
</pallas_src>

<mosaic_0001>
module attributes {stable_mosaic.version = 11 : i64} {
  func.func @_proj_kernel(%arg0: i32, %arg1: i32, %arg2: memref<1x80x32xf32, #tpu.memory_space<vmem>>, %arg3: memref<1x80x32xf32, #tpu.memory_space<vmem>>, %arg4: memref<32x32xbf16, #tpu.memory_space<vmem>>, %arg5: memref<1x32xf32, #tpu.memory_space<vmem>>, %arg6: memref<32x96xbf16, #tpu.memory_space<vmem>>, %arg7: memref<1x96xf32, #tpu.memory_space<vmem>>, %arg8: memref<1x80x32xbf16, #tpu.memory_space<vmem>>, %arg9: memref<1x80x96xf32, #tpu.memory_space<vmem>>) attributes {dimension_semantics = [#tpu.dimension_semantics<parallel>, #tpu.dimension_semantics<parallel>], iteration_bounds = array<i64: 2, 1>, scalar_prefetch = 0 : i64, scratch_operands = 0 : i64, tpu.core_type = #tpu.core_type<tc>, window_params = [{transform_indices = @transform_0, window_bounds = array<i64: 1, 80, 32>}, {transform_indices = @transform_1, window_bounds = array<i64: 1, 80, 32>}, {pipeline_mode = #tpu.pipeline_mode<synchronous>, transform_indices = @transform_2, window_bounds = array<i64: 32, 32>}, {pipeline_mode = #tpu.pipeline_mode<synchronous>, transform_indices = @transform_3, window_bounds = array<i64: 1, 32>}, {pipeline_mode = #tpu.pipeline_mode<synchronous>, transform_indices = @transform_4, window_bounds = array<i64: 32, 96>}, {pipeline_mode = #tpu.pipeline_mode<synchronous>, transform_indices = @transform_5, window_bounds = array<i64: 1, 96>}, {transform_indices = @transform_6, window_bounds = array<i64: 1, 80, 32>}, {transform_indices = @transform_7, window_bounds = array<i64: 1, 80, 96>}]} {
    %c0 = arith.constant 0 : index
    %c0_0 = arith.constant 0 : index
    %c0_1 = arith.constant 0 : index
    %0 = vector.load %arg2[%c0, %c0_0, %c0_1] : memref<1x80x32xf32, #tpu.memory_space<vmem>>, vector<1x80x32xf32>
    %1 = vector.shape_cast %0 : vector<1x80x32xf32> to vector<80x32xf32>
    %c0_2 = arith.constant 0 : index
    %c0_3 = arith.constant 0 : index
    %c0_4 = arith.constant 0 : index
    %2 = vector.load %arg3[%c0_2, %c0_3, %c0_4] : memref<1x80x32xf32, #tpu.memory_space<vmem>>, vector<1x80x32xf32>
    %3 = vector.shape_cast %2 : vector<1x80x32xf32> to vector<80x32xf32>
    %4 = arith.addf %1, %3 : vector<80x32xf32>
    %5 = arith.truncf %4 : vector<80x32xf32> to vector<80x32xbf16>
    %6 = arith.truncf %1 : vector<80x32xf32> to vector<80x32xbf16>
    %c0_5 = arith.constant 0 : index
    %c0_6 = arith.constant 0 : index
    %7 = vector.load %arg4[%c0_5, %c0_6] : memref<32x32xbf16, #tpu.memory_space<vmem>>, vector<32x32xbf16>
    %cst = arith.constant dense<0.000000e+00> : vector<80x32xf32>
    %8 = tpu.matmul %6, %7, %cst {dimension_numbers = #tpu.dot_dimension_numbers<[1], [0], [0], [1], [0, 0, 1, 1], [], []>} : vector<80x32xbf16>, vector<32x32xbf16>, vector<80x32xf32> -> vector<80x32xf32>
    %c0_7 = arith.constant 0 : index
    %c0_8 = arith.constant 0 : index
    %9 = vector.load %arg5[%c0_7, %c0_8] : memref<1x32xf32, #tpu.memory_space<vmem>>, vector<1x32xf32>
    %10 = vector.broadcast %9 : vector<1x32xf32> to vector<80x32xf32>
    %11 = arith.addf %8, %10 : vector<80x32xf32>
    %c0_9 = arith.constant 0 : index
    %c0_10 = arith.constant 0 : index
    %12 = vector.load %arg6[%c0_9, %c0_10] : memref<32x96xbf16, #tpu.memory_space<vmem>>, vector<32x96xbf16>
    %cst_11 = arith.constant dense<0.000000e+00> : vector<80x96xf32>
    %13 = tpu.matmul %5, %12, %cst_11 {dimension_numbers = #tpu.dot_dimension_numbers<[1], [0], [0], [1], [0, 0, 1, 1], [], []>} : vector<80x32xbf16>, vector<32x96xbf16>, vector<80x96xf32> -> vector<80x96xf32>
    %c0_12 = arith.constant 0 : index
    %c0_13 = arith.constant 0 : index
    %14 = vector.load %arg7[%c0_12, %c0_13] : memref<1x96xf32, #tpu.memory_space<vmem>>, vector<1x96xf32>
    %15 = vector.broadcast %14 : vector<1x96xf32> to vector<80x96xf32>
    %16 = arith.addf %13, %15 : vector<80x96xf32>
    %17 = arith.truncf %11 : vector<80x32xf32> to vector<80x32xbf16>
    %c0_14 = arith.constant 0 : index
    %c0_15 = arith.constant 0 : index
    %c0_16 = arith.constant 0 : index
    %18 = vector.load %arg8[%c0_14, %c0_15, %c0_16] : memref<1x80x32xbf16, #tpu.memory_space<vmem>>, vector<1x80x32xbf16>
    %19 = vector.shape_cast %18 : vector<1x80x32xbf16> to vector<80x32xbf16>
    %20 = vector.shape_cast %17 : vector<80x32xbf16> to vector<1x80x32xbf16>
    tpu.vector_store %arg8[%c0_14, %c0_15, %c0_16], %20 {strides = array<i32>} : memref<1x80x32xbf16, #tpu.memory_space<vmem>>, vector<1x80x32xbf16>,
    %c0_17 = arith.constant 0 : index
    %c0_18 = arith.constant 0 : index
    %c0_19 = arith.constant 0 : index
    %21 = vector.load %arg9[%c0_17, %c0_18, %c0_19] : memref<1x80x96xf32, #tpu.memory_space<vmem>>, vector<1x80x96xf32>
    %22 = vector.shape_cast %21 : vector<1x80x96xf32> to vector<80x96xf32>
    %23 = vector.shape_cast %16 : vector<80x96xf32> to vector<1x80x96xf32>
    tpu.vector_store %arg9[%c0_17, %c0_18, %c0_19], %23 {strides = array<i32>} : memref<1x80x96xf32, #tpu.memory_space<vmem>>, vector<1x80x96xf32>,
    return
  }
  func.func @transform_0(%arg0: i32, %arg1: i32) -> (i32, i32, i32) {
    %c0_i32 = arith.constant 0 : i32
    %c0_i32_0 = arith.constant 0 : i32
    return %arg0, %arg1, %c0_i32 : i32, i32, i32
  }
  func.func @transform_1(%arg0: i32, %arg1: i32) -> (i32, i32, i32) {
    %c0_i32 = arith.constant 0 : i32
    %c0_i32_0 = arith.constant 0 : i32
    return %arg0, %arg1, %c0_i32 : i32, i32, i32
  }
  func.func @transform_2(%arg0: i32, %arg1: i32) -> (i32, i32) {
    %c0_i32 = arith.constant 0 : i32
    %c0_i32_0 = arith.constant 0 : i32
    %c0_i32_1 = arith.constant 0 : i32
    return %c0_i32, %c0_i32_0 : i32, i32
  }
  func.func @transform_3(%arg0: i32, %arg1: i32) -> (i32, i32) {
    %c0_i32 = arith.constant 0 : i32
    %c0_i32_0 = arith.constant 0 : i32
    %c0_i32_1 = arith.constant 0 : i32
    return %c0_i32, %c0_i32_0 : i32, i32
  }
  func.func @transform_4(%arg0: i32, %arg1: i32) -> (i32, i32) {
    %c0_i32 = arith.constant 0 : i32
    %c0_i32_0 = arith.constant 0 : i32
    %c0_i32_1 = arith.constant 0 : i32
    return %c0_i32, %c0_i32_0 : i32, i32
  }
  func.func @transform_5(%arg0: i32, %arg1: i32) -> (i32, i32) {
    %c0_i32 = arith.constant 0 : i32
    %c0_i32_0 = arith.constant 0 : i32
    %c0_i32_1 = arith.constant 0 : i32
    return %c0_i32, %c0_i32_0 : i32, i32
  }
  func.func @transform_6(%arg0: i32, %arg1: i32) -> (i32, i32, i32) {
    %c0_i32 = arith.constant 0 : i32
    %c0_i32_0 = arith.constant 0 : i32
    return %arg0, %arg1, %c0_i32 : i32, i32, i32
  }
  func.func @transform_7(%arg0: i32, %arg1: i32) -> (i32, i32, i32) {
    %c0_i32 = arith.constant 0 : i32
    %c0_i32_0 = arith.constant 0 : i32
    return %arg0, %arg1, %c0_i32 : i32, i32, i32
  }
}

</mosaic_0001>

<bundles_post_ra>
// kernel: tpu_custom_call.1
= control target key start
LH: loop header
LB: loop body
LE: loop exit
PB: predicated region body
PF: predicated region fallthrough
CT: control target
= control target key end

     0   :  { %13 = vsyncpa [#allocation3], 0  ;;  %s1207_s0 = inlined_call_operand.vmem [shape: f32[2,80,32], index: 0, kind: input, shape index: {}]   ;;  %s1208_s1 = inlined_call_operand.vmem [shape: f32[2,80,32], index: 1, kind: input, shape index: {}]   ;;  %s1209_s2 = inlined_call_operand.vmem [shape: bf16[32,32], index: 2, kind: input, shape index: {}]   ;;  %s1210_s3 = inlined_call_operand.vmem [shape: f32[1,32], index: 3, kind: input, shape index: {}]   ;;  %s1211_s4 = inlined_call_operand.vmem [shape: bf16[32,96], index: 4, kind: input, shape index: {}]   ;;  %s1212_s5 = inlined_call_operand.vmem [shape: f32[1,96], index: 5, kind: input, shape index: {}]   ;;  %s1213_s6 = inlined_call_operand.vmem [shape: bf16[2,80,32], index: 6, kind: output, shape index: {0}]   ;;  %s1214_s7 = inlined_call_operand.hbm [shape: f32[2,80,96], index: 7, kind: output, shape index: {1}]  }
   0x1   :  { %15 = vsyncpa [#allocation3 + $0x1], 0  ;;  %s975_s24 = smov 0   ;;  %s977_s25 = smov 0  }
   0x2   :  { %s979_s26 = smov 0   ;;  %s981_s27 = smov 0  }
   0x3   :  { %s983_s28 = smov 0   ;;  %s985_s29 = smov 0  }
   0x4 LB: > { %s745_s30 = sadd.s32 4294967295, %s931_s29   ;;  %s746_s8 = sadd.s32 4294967294, %s931_s29   ;;  %s931_s29 = sphi %s985_s29, %s21_s29   ;;  %s927_s28 = sphi %s983_s28, %s1221_s28   ;;  %s923_s27 = sphi %s981_s27, %s1220_s27   ;;  %s919_s26 = sphi %s979_s26, %s1219_s26   ;;  %s915_s25 = sphi %s977_s25, %s1218_s25   ;;  %s911_s24 = sphi %s975_s24, %s1217_s24  }
   0x5   : > { %s33_s9 = sadd.s32 1, %s927_s28  ;;  %s210_s10 = sadd.s32 1, %s919_s26 }
   0x6   : > { %p35_p0 = scmp.ge.s32.totalorder %s33_s9, 2  ;;  %p220_p1 = scmp.ne.s32.totalorder %s919_s26, %s915_s25 }
   0x7   : > { %p221_p2 = scmp.eq.s32.totalorder %s745_s30, 1  ;;  %p226_p3 = scmp.ne.s32.totalorder %s915_s25, %s911_s24 }
   0x8   : > { %s1223_s9 = smov (%p35_p0, %s33_s9), 0  ;;  %p227_p5 = scmp.eq.s32.totalorder %s746_s8, 1 }
   0x9   : > { %p1015_p4 = por %p221_p2, %p220_p1  ;;  %s205_s12 = ssub.s32 %s927_s28, %s1223_s9 }
   0xa   : > { %p749_p6 = scmp.ge.s32.totalorder %s931_s29, 1  ;;  %p208_p7 = scmp.eq.s32.totalorder %s205_s12, 0 }
   0xb   : > { %p1022_p8 = por %p227_p5, %p226_p3  ;;  %p283_p9 = scmp.lt.s32.totalorder %s931_s29, 3 }
   0xc   : > { %s1028_s14 = scalar_select %p208_p7, %s919_s26, %s210_s10  }
   0xd   : > { %p284_p10 = pnand %p749_p6, %p283_p9 }
   0xe   : > { %p338_p11 = scmp.lt.s32.totalorder (!%p284_p10), %s923_s27, 1  ;;  %s334_s18 = sand.u32 (!%p284_p10), 1, %s915_s25  }
   0xf   : > { %287 = sbr.rel (%p284_p10) target bundleno = 203 (0xcb), region = 44 }
  0x10   : > { %s790_s22 = smul.u32 (!%p284_p10), 80, %s334_s18 }
  0x11   : > { %s793_s16 = smul.u32 (!%p284_p10), 80, %s923_s27 }
  0x13   : > { %s607_s20 = scalar_lea.hbm (!%p284_p10), %s1214_s7, %s793_s16  ;;  %s873_s16 = scalar_lea.hbm (!%p284_p10), %s1214_s7, 160 }
  0x14   : > { %v783_v0 = vld [vmem:[%s1209_s2 + $0x8] sm:$0xff]  ;;  %v782_v2 = vld [vmem:[%s1209_s2] sm:$0xff]  ;;  %s1044_s23 = scalar_select %p338_p11, %s923_s27, 1  ;;  %vm429_vm0 = vcmask 261120   ;;  %vm558_vm1 = vcmask 257024   ;;  %vm569_vm2 = vcmask 785408  }
  0x15   : > { %v785_v1 = vld [vmem:[%s1211_s4 + $0x8] sm:$0xff]  ;;  %451 = vmatpush.bf16.msra.mxu0 %v783_v0  ;;  %v784_v3 = vld [vmem:[%s1211_s4] sm:$0xff]  ;;  %786 = vmatpush.bf16.msra.mxu2 %v783_v0 }
  0x16   : > { %520 = vmatpush.bf16.msra.mxu1 %v785_v1  ;;  %788 = vmatpush.bf16.msra.mxu3 %v785_v1  ;;  %s791_s30 = smul.u32 80, %s1044_s23  ;;  %v1091_v44 = vld [vmem:[%s1210_s3] ss:$0 sm:$0xff] }
  0x17   : > { %s792_s21 = smul.u32 40, %s1044_s23  ;;  %v1099_v46 = vld [vmem:[%s1212_s5] ss:$0 sm:$0xff]  ;;  %s1110_s23 = scalar_lea.vmem [#allocation2], %s790_s22 }
  0x18   : > { %s1050_s12 = scalar_lea.vmem %s1207_s0, %s791_s30  ;;  %s1055_s17 = scalar_lea.vmem %s1208_s1, %s791_s30 }
  0x19   : > { %452 = vmatpush.bf16.msra.mxu0 %v782_v2  ;;  %787 = vmatpush.bf16.msra.mxu2 %v782_v2  ;;  %v369_v4 = vld [vmem:[%s1050_s12] sm:$0xff]  ;;  %v370_v5 = vld [vmem:[%s1050_s12 + $0x8] sm:$0xff]  ;;  %v375_v10 = vld [vmem:[%s1050_s12 + $0x30] sm:$0xff]  ;;  %s1105_s15 = scalar_lea.vmem %s1213_s6, %s792_s21  ;;  %s608_s27 = sshll.u32 %s1110_s23, 4  ;;  %s609_s27 = int_to_ptr.vmem [resolvable:$true] %s608_s27 }
  0x1a   : > { %521 = vmatpush.bf16.msra.mxu1 %v784_v3  ;;  %789 = vmatpush.bf16.msra.mxu3 %v784_v3  ;;  %v379_v6 = vld [vmem:[%s1055_s17] sm:$0xff]  ;;  %v404_v7 = vpack.c.bf16 %v370_v5, %v369_v4  ;;  %v380_v8 = vld [vmem:[%s1055_s17 + $0x8] sm:$0xff]  ;;  %v376_v11 = vld [vmem:[%s1050_s12 + $0x38] sm:$0xff]  ;;  %s610_s21 = sshll.u32 %s607_s20, 4  ;;  %s590_s22 = scalar_lea.sflag [#allocation3], %s334_s18  ;;  %s611_s21 = int_to_ptr.hbm [resolvable:$true] %s610_s21 }
  0x1b   : > { %v389_v9 = vadd.f32 %v379_v6, %v369_v4  ;;  %v390_v12 = vadd.f32 %v380_v8, %v370_v5  ;;  %v407_v13 = vpack.c.bf16 %v376_v11, %v375_v10  ;;  %v385_v14 = vld [vmem:[%s1055_s17 + $0x30] sm:$0xff]  ;;  %v386_v15 = vld [vmem:[%s1055_s17 + $0x38] sm:$0xff]  ;;  %v377_v24 = vld [vmem:[%s1050_s12 + $0x40] sm:$0xff]  ;;  %s867_s30 = sshra.s32 %s611_s21, 4  ;;  %s868_s30 = int_to_ptr.hbm [resolvable:$true] %s867_s30 }
  0x1c   : > { %761 = vmatmul.msk.bf16.vlgmr.msra.gmra.mxu0 %vm429_vm0, %v404_v7  ;;  %v395_v16 = vadd.f32 %v385_v14, %v375_v10  ;;  %v396_v17 = vadd.f32 %v386_v15, %v376_v11  ;;  %v371_v20 = vld [vmem:[%s1050_s12 + $0x10] sm:$0xff]  ;;  %v372_v21 = vld [vmem:[%s1050_s12 + $0x18] sm:$0xff]  ;;  %v378_v25 = vld [vmem:[%s1050_s12 + $0x48] sm:$0xff]  ;;  %s869_s8 = scalar_lea.hbm %s868_s30, 80  ;;  %p874_p1 = scmp.lt.s32.totalorder %s868_s30, %s1214_s7 }
  0x1d   : > { %v399_v18 = vpack.c.bf16 %v390_v12, %v389_v9  ;;  %764 = vmatmul.msk.bf16.vlgmr.msra.gmra.mxu2 %vm429_vm0, %v407_v13  ;;  %v381_v22 = vld [vmem:[%s1055_s17 + $0x10] sm:$0xff]  ;;  %v382_v23 = vld [vmem:[%s1055_s17 + $0x18] sm:$0xff]  ;;  %v387_v26 = vld [vmem:[%s1055_s17 + $0x40] sm:$0xff]  ;;  %v405_v30 = vpack.c.bf16 %v372_v21, %v371_v20  ;;  %v408_v33 = vpack.c.bf16 %v378_v25, %v377_v24  ;;  %p870_p12 = scmp.ne.s32.totalorder %s868_s30, %s869_s8  ;;  %p875_p2 = scmp.lt.s32.totalorder %s873_s16, %s869_s8 }
  0x1e   : > { %v402_v19 = vpack.c.bf16 %v396_v17, %v395_v16  ;;  %v388_v27 = vld [vmem:[%s1055_s17 + $0x48] sm:$0xff]  ;;  %v391_v28 = vadd.f32 %v381_v22, %v371_v20  ;;  %v392_v29 = vadd.f32 %v382_v23, %v372_v21  ;;  %v397_v31 = vadd.f32 %v387_v26, %v377_v24  ;;  %v373_v36 = vld [vmem:[%s1050_s12 + $0x20] sm:$0xff] }
  0x1f   : > { %774 = vmatmul.msk.bf16.vlgmr.msra.gmra.mxu1 %vm429_vm0, %v399_v18  ;;  %v398_v32 = vadd.f32 %v388_v27, %v378_v25  ;;  %v374_v37 = vld [vmem:[%s1050_s12 + $0x28] sm:$0xff]  ;;  %v383_v38 = vld [vmem:[%s1055_s17 + $0x20] sm:$0xff]  ;;  %p871_p13 = pnand %p870_p12, %p1015_p4  ;;  %p876_p3 = por %p875_p2, %p874_p1 }
  0x20   : > { %777 = vmatmul.msk.bf16.vlgmr.msra.gmra.mxu3 %vm429_vm0, %v402_v19  ;;  %v400_v34 = vpack.c.bf16 %v392_v29, %v391_v28  ;;  %v384_v39 = vld [vmem:[%s1055_s17 + $0x28] sm:$0xff]  ;;  %v393_v40 = vadd.f32 %v383_v38, %v373_v36  ;;  %v406_v42 = vpack.c.bf16 %v374_v37, %v373_v36 }
  0x21   : > { %v403_v35 = vpack.c.bf16 %v398_v32, %v397_v31  ;;  %v394_v41 = vadd.f32 %v384_v39, %v374_v37  ;;  %p872_p0 = pneg %p871_p13 }
  0x23   : > { %v401_v43 = vpack.c.bf16 %v394_v41, %v393_v40  ;;  %p877_p5 = pnand %p876_p3, %p872_p0 }
  0x2c   : > { %762 = vmatmul.msk.bf16.gmra.mxu0 %vm429_vm0, %v405_v30 }
  0x2d   : > { %765 = vmatmul.msk.bf16.gmra.mxu2 %vm429_vm0, %v408_v33 }
  0x2f   : > { %775 = vmatmul.msk.bf16.gmra.mxu1 %vm429_vm0, %v400_v34 }
  0x30   : > { %778 = vmatmul.msk.bf16.gmra.mxu3 %vm429_vm0, %v403_v35 }
  0x3c   : > { %763 = vmatmul.msk.bf16.gmra.mxu0 %vm429_vm0, %v406_v42 }
  0x3f   : > { %776 = vmatmul.msk.bf16.gmra.mxu1 %vm429_vm0, %v401_v43 }
  0x99   : > { %v454_v45 = vpop.f32.mrf.mxu0 }
  0x9a   : > { %v455_v47 = vadd.f32 %v1091_v44, %v454_v45 }
  0x9c   : > { %v548_v48 = vpack.c.bf16 %v455_v47, %v455_v47  ;;  %v523_v49 = vpop.f32.mrf.mxu1 }
  0x9d   : > { %v524_v50 = vadd.f32 %v1099_v46, %v523_v49 }
  0x9e   : > { %559 = vst.msk [vmem:[%s1105_s15] sm:$0xf] %vm558_vm1, %v548_v48 }
  0x9f   : > { %570 = vst.msk [vmem:[%s1110_s23] sm:$0xff] %vm569_vm2, %v524_v50 }
  0xa0   : > { %v469_v51 = vpop.f32.mrf.mxu2 }
  0xa1   : > { %v456_v52 = vpop.f32.mrf.mxu0  ;;  %v470_v53 = vadd.f32 %v1091_v44, %v469_v51 }
  0xa2   : > { %v457_v54 = vadd.f32 %v1091_v44, %v456_v52 }
  0xa3   : > { %v554_v55 = vpack.c.bf16 %v470_v53, %v470_v53  ;;  %v538_v56 = vpop.f32.mrf.mxu3 }
  0xa4   : > { %v549_v57 = vpack.c.bf16 %v457_v54, %v457_v54  ;;  %v525_v58 = vpop.f32.mrf.mxu1  ;;  %v539_v59 = vadd.f32 %v1099_v46, %v538_v56 }
  0xa5   : > { %565 = vst.msk [vmem:[%s1105_s15 + $0x18] sm:$0xf] %vm558_vm1, %v554_v55  ;;  %v526_v60 = vadd.f32 %v1099_v46, %v525_v58 }
  0xa6   : > { %560 = vst.msk [vmem:[%s1105_s15 + $0x4] sm:$0xf] %vm558_vm1, %v549_v57 }
  0xa7   : > { %571 = vst.msk [vmem:[%s1110_s23 + $0x8] sm:$0xff] %vm569_vm2, %v526_v60 }
  0xa8   : > { %576 = vst.msk [vmem:[%s1110_s23 + $0x30] sm:$0xff] %vm569_vm2, %v539_v59  ;;  %v471_v61 = vpop.f32.mrf.mxu2 }
  0xa9   : > { %v459_v62 = vpop.f32.mrf.mxu0  ;;  %v472_v63 = vadd.f32 %v1091_v44, %v471_v61 }
  0xaa   : > { %v460_v0 = vadd.f32 %v1091_v44, %v459_v62 }
  0xab   : > { %v555_v1 = vpack.c.bf16 %v472_v63, %v472_v63  ;;  %v540_v2 = vpop.f32.mrf.mxu3 }
  0xac   : > { %v550_v3 = vpack.c.bf16 %v460_v0, %v460_v0  ;;  %v528_v4 = vpop.f32.mrf.mxu1  ;;  %v541_v5 = vadd.f32 %v1099_v46, %v540_v2 }
  0xad   : > { %566 = vst.msk [vmem:[%s1105_s15 + $0x1c] sm:$0xf] %vm558_vm1, %v555_v1  ;;  %v529_v6 = vadd.f32 %v1099_v46, %v528_v4 }
  0xae   : > { %561 = vst.msk [vmem:[%s1105_s15 + $0x8] sm:$0xf] %vm558_vm1, %v550_v3 }
  0xaf   : > { %572 = vst.msk [vmem:[%s1110_s23 + $0x10] sm:$0xff] %vm569_vm2, %v529_v6 }
  0xb0   : > { %577 = vst.msk [vmem:[%s1110_s23 + $0x38] sm:$0xff] %vm569_vm2, %v541_v5  ;;  %v474_v7 = vpop.f32.mrf.mxu2 }
  0xb1   : > { %v461_v8 = vpop.f32.mrf.mxu0  ;;  %v475_v9 = vadd.f32 %v1091_v44, %v474_v7 }
  0xb2   : > { %v462_v10 = vadd.f32 %v1091_v44, %v461_v8 }
  0xb3   : > { %v556_v11 = vpack.c.bf16 %v475_v9, %v475_v9  ;;  %v543_v12 = vpop.f32.mrf.mxu3 }
  0xb4   : > { %v551_v13 = vpack.c.bf16 %v462_v10, %v462_v10  ;;  %v530_v14 = vpop.f32.mrf.mxu1  ;;  %v544_v15 = vadd.f32 %v1099_v46, %v543_v12 }
  0xb5   : > { %567 = vst.msk [vmem:[%s1105_s15 + $0x20] sm:$0xf] %vm558_vm1, %v556_v11  ;;  %v531_v16 = vadd.f32 %v1099_v46, %v530_v14 }
  0xb6   : > { %562 = vst.msk [vmem:[%s1105_s15 + $0xc] sm:$0xf] %vm558_vm1, %v551_v13 }
  0xb7   : > { %573 = vst.msk [vmem:[%s1110_s23 + $0x18] sm:$0xff] %vm569_vm2, %v531_v16 }
  0xb8   : > { %578 = vst.msk [vmem:[%s1110_s23 + $0x40] sm:$0xff] %vm569_vm2, %v544_v15  ;;  %v476_v17 = vpop.f32.mrf.mxu2 }
  0xb9   : > { %v464_v18 = vpop.f32.mrf.mxu0  ;;  %v477_v19 = vadd.f32 %v1091_v44, %v476_v17 }
  0xba   : > { %v465_v20 = vadd.f32 %v1091_v44, %v464_v18 }
  0xbb   : > { %v557_v21 = vpack.c.bf16 %v477_v19, %v477_v19  ;;  %v545_v22 = vpop.f32.mrf.mxu3 }
  0xbc   : > { %v552_v23 = vpack.c.bf16 %v465_v20, %v465_v20  ;;  %v533_v24 = vpop.f32.mrf.mxu1  ;;  %v546_v25 = vadd.f32 %v1099_v46, %v545_v22 }
  0xbd   : > { %568 = vst.msk [vmem:[%s1105_s15 + $0x24] sm:$0xf] %vm558_vm1, %v557_v21  ;;  %v534_v26 = vadd.f32 %v1099_v46, %v533_v24 }
  0xbe   : > { %563 = vst.msk [vmem:[%s1105_s15 + $0x10] sm:$0xf] %vm558_vm1, %v552_v23 }
  0xbf   : > { %574 = vst.msk [vmem:[%s1110_s23 + $0x20] sm:$0xff] %vm569_vm2, %v534_v26 }
  0xc0   : > { %579 = vst.msk [vmem:[%s1110_s23 + $0x48] sm:$0xff] %vm569_vm2, %v546_v25 }
  0xc1   : > { %v466_v27 = vpop.f32.mrf.mxu0 }
  0xc2   : > { %v467_v28 = vadd.f32 %v1091_v44, %v466_v27 }
  0xc4   : > { %v553_v29 = vpack.c.bf16 %v467_v28, %v467_v28  ;;  %v535_v30 = vpop.f32.mrf.mxu1 }
  0xc5   : > { %v536_v31 = vadd.f32 %v1099_v46, %v535_v30 }
  0xc6   : > { %564 = vst.msk [vmem:[%s1105_s15 + $0x14] sm:$0xf] %vm558_vm1, %v553_v29 }
  0xc7   : > { %575 = vst.msk [vmem:[%s1110_s23 + $0x28] sm:$0xff] %vm569_vm2, %v536_v31 }
  0xc8   : > { %880 = shalt.err (!%p877_p5)
}
  0xc9   : > { %s933_s18 = smov 128   ;;  %s934_s15 = smov 8  }
  0xca   : > { %794 = dma.vmem_to_hbm [thread:$0]  (%p1015_p4), %s609_s27, 1280, %s611_s21, %s590_s22, %s933_s18, %s933_s18, %s934_s15  }
  0xcb PF: > { %p800_p6 = scmp.ge.s32.totalorder %s931_s29, 2  ;;  %s637_s23 = sand.u32 1, %s911_s24  }
  0xcc   : > { %s638_s20 = scalar_lea.sflag [#allocation3], %s637_s23 }
  0xcd   : > { %p797_p7 = pnand %p800_p6, %p1022_p8 }
  0xcf   : > { %p798_p9 = pneg %p797_p7 }
  0xd1   : > { %906 = dma.done.wait (%p798_p9), %s638_s20, 1280  }
  0xd2   : > { %908 = vsyncadd (%p798_p9), %s638_s20, 4294966016  ;;  %s21_s29 = sadd.s32 1, %s931_s29   ;;  %s1217_s24 = smov %s915_s25 }
  0xd3   : > { %p18_p10 = scmp.ge.s32.totalorder %s21_s29, 4   ;;  %s1218_s25 = smov %s919_s26 }
  0xd4   : > { %s1219_s26 = smov %s1028_s14  ;;  %s1220_s27 = smov %s927_s28 }
  0xd5   : > { %s1221_s28 = smov %s1223_s9  ;;  %20 = sbr.rel (!%p18_p10) target bundleno = 4 (0x4), region = 94 }
  0xda   :  { %644 = vsyncpa [#allocation3], 1 }
  0xdb   :  { %646 = vsyncpa [#allocation3 + $0x1], 1 }

</bundles_post_ra>
